<compile_context>
chip_gen: v5e
topology: v5e:2x2
jax: 0.10.0
libtpu: 0.0.40
codegen_flags: <defaults>
</compile_context>

<pallas_src>
import jax
import jax.numpy as jnp
from jax.experimental import pallas as pl
from jax.experimental.pallas import tpu as pltpu


def _choose_layout(N, B, itemsize, max_tile_bytes=2 * 1024 * 1024):
    """Pick a lane-dense (R, C) factorization of the per-(b,t) spatial size N
    and a row-tile r_tile keeping each input tile <= max_tile_bytes."""
    C = N  # fallback: full spatial extent as lane dim (legal: equals full dim)
    for cand in (2048, 1024, 512, 384, 256, 128):
        if N % cand == 0:
            C = cand
            break
    R = N // C
    max_rows = max(1, max_tile_bytes // (B * C * itemsize))
    if R <= max_rows:
        r_tile = R
    else:
        r_tile = 0
        d = 8 * (max_rows // 8)
        while d >= 8:
            if R % d == 0:          # multiple of 8 (sublane-aligned) divisor of R
                r_tile = d
                break
            d -= 8
        if r_tile == 0:
            # TODO(synk): masked ragged last row-tile not implemented; use full slab.
            r_tile = R
    return C, R, r_tile


def _make_kernel(threshold, n_row_tiles):
    thr = float(threshold)

    def kernel(logits_ref, target_ref, out_ref, acc_ref):
        r = pl.program_id(1)

        @pl.when(r == 0)
        def _init():
            acc_ref[...] = jnp.zeros_like(acc_ref)

        lg = logits_ref[...].astype(jnp.float32)   # (B, 1, r_tile, C)
        tg = target_ref[...].astype(jnp.float32)
        not_nan = tg > thr                         # NaN compares False, like torch
        diff = jnp.where(not_nan, lg - tg, 0.0)
        # Reduce over batch + row (sublane) axes only; keep the cross-lane
        # reduce out of the hot loop.
        acc_ref[...] += jnp.sum(diff * diff, axis=(0, 1, 2))[None, :]

        @pl.when(r == n_row_tiles - 1)
        def _finish():
            total = jnp.sum(acc_ref[...])          # one cross-lane reduce per t
            out_ref[...] = jnp.broadcast_to(total, out_ref.shape)

    return kernel


def nonan_rmse(logits, target, threshold=-1.0):
    B, T, ch, H, W = logits.shape
    assert ch == 1 and target.shape == logits.shape
    N = H * W
    itemsize = jnp.dtype(logits.dtype).itemsize
    C, R, r_tile = _choose_layout(N, B, itemsize)
    n_row_tiles = R // r_tile

    # Free reshapes: collapse the singleton channel + (H, W) into (R, C).
    lg = logits.reshape(B, T, R, C)
    tg = target.reshape(B, T, R, C)

    kernel = _make_kernel(threshold, n_row_tiles)
    in_spec = pl.BlockSpec((B, 1, r_tile, C), lambda t, r: (0, t, r, 0))

    per_t = pl.pallas_call(
        kernel,
        out_shape=jax.ShapeDtypeStruct((T, 1, 128), jnp.float32),
        grid_spec=pltpu.PrefetchScalarGridSpec(
            num_scalar_prefetch=0,
            grid=(T, n_row_tiles),
            in_specs=[in_spec, in_spec],
            out_specs=pl.BlockSpec((1, 1, 128), lambda t, r: (t, 0, 0)),
            scratch_shapes=[pltpu.VMEM((1, C), jnp.float32)],
        ),
        compiler_params=pltpu.CompilerParams(
            dimension_semantics=("parallel", "arbitrary")),
        cost_estimate=pl.CostEstimate(
            flops=4 * B * T * N,
            transcendentals=0,
            bytes_accessed=2 * B * T * N * itemsize + T * 128 * 4),
    )(lg, tg)

    diff2_sum_t = per_t[:, 0, 0]                 # (T,) sums over (B, H, W)
    # sqrt(mean over batch) per t, then mean over T — negligible scalar epilogue.
    return jnp.sqrt(diff2_sum_t / B).mean()


def nonan_rmse_ref(logits, target, threshold=-1.0):
    """Pure-JAX reference mirroring the PyTorch forward."""
    logits = jnp.squeeze(logits, axis=2).astype(jnp.float32)
    target = jnp.squeeze(target, axis=2).astype(jnp.float32)
    not_nan = target > threshold
    diff = jnp.where(not_nan, logits - target, 0.0)
    diff2m = jnp.square(diff).sum(axis=(-1, -2)).mean(axis=0)   # (T,)
    return jnp.sqrt(diff2m).mean(axis=0)                        # scalar


if __name__ == "__main__":
    B, T, H, W = 2, 8, 16, 16
    key = jax.random.PRNGKey(0)
    k1, k2, k3 = jax.random.split(key, 3)

    logits = jax.random.normal(k1, (B, T, 1, H, W), dtype=jnp.float32)
    target = jax.random.normal(k2, (B, T, 1, H, W), dtype=jnp.float32)
    # ~10% missing values: `target > -1` is False for NaN, so those positions
    # are excluded — same behaviour as the torch module.
    miss = jax.random.uniform(k3, (B, T, 1, H, W)) < 0.1
    target = jnp.where(miss, jnp.float32(jnp.nan), target)

    out = jax.block_until_ready(nonan_rmse(logits, target, threshold=-1.0))
    ref = nonan_rmse_ref(logits, target, threshold=-1.0)

    assert jnp.isfinite(out), out
    assert jnp.allclose(out, ref, rtol=1e-5, atol=1e-5), (out, ref)
    print("KERNEL_OK")
</pallas_src>

<mosaic_0001>
module attributes {stable_mosaic.version = 11 : i64} {
  func.func @kernel(%arg0: i32, %arg1: i32, %arg2: memref<2x1x1x256xf32, #tpu.memory_space<vmem>>, %arg3: memref<2x1x1x256xf32, #tpu.memory_space<vmem>>, %arg4: memref<1x1x128xf32, #tpu.memory_space<vmem>>, %arg5: memref<1x256xf32, #tpu.memory_space<vmem>>) attributes {dimension_semantics = [#tpu.dimension_semantics<parallel>, #tpu.dimension_semantics<arbitrary>], iteration_bounds = array<i64: 8, 1>, scalar_prefetch = 0 : i64, scratch_operands = 1 : i64, tpu.core_type = #tpu.core_type<tc>, window_params = [{transform_indices = @transform_0, window_bounds = array<i64: 2, 1, 1, 256>}, {transform_indices = @transform_1, window_bounds = array<i64: 2, 1, 1, 256>}, {transform_indices = @transform_2, window_bounds = array<i64: 1, 1, 128>}]} {
    %c0_i32 = arith.constant 0 : i32
    %0 = arith.cmpi eq, %arg1, %c0_i32 : i32
    %1 = arith.extui %0 : i1 to i32
    %c0_i32_0 = arith.constant 0 : i32
    %2 = arith.cmpi ne, %1, %c0_i32_0 : i32
    scf.if %2 {
      %cst_16 = arith.constant 0.000000e+00 : f32
      %19 = vector.broadcast %cst_16 : f32 to vector<1x256xf32>
      %c0_17 = arith.constant 0 : index
      %c0_18 = arith.constant 0 : index
      %20 = vector.load %arg5[%c0_17, %c0_18] : memref<1x256xf32, #tpu.memory_space<vmem>>, vector<1x256xf32>
      tpu.vector_store %arg5[%c0_17, %c0_18], %19 {strides = array<i32>} : memref<1x256xf32, #tpu.memory_space<vmem>>, vector<1x256xf32>,
    } else {
    }
    %c0 = arith.constant 0 : index
    %c0_1 = arith.constant 0 : index
    %c0_2 = arith.constant 0 : index
    %c0_3 = arith.constant 0 : index
    %3 = vector.load %arg2[%c0, %c0_1, %c0_2, %c0_3] : memref<2x1x1x256xf32, #tpu.memory_space<vmem>>, vector<2x1x1x256xf32>
    %c0_4 = arith.constant 0 : index
    %c0_5 = arith.constant 0 : index
    %c0_6 = arith.constant 0 : index
    %c0_7 = arith.constant 0 : index
    %4 = vector.load %arg3[%c0_4, %c0_5, %c0_6, %c0_7] : memref<2x1x1x256xf32, #tpu.memory_space<vmem>>, vector<2x1x1x256xf32>
    %cst = arith.constant -1.000000e+00 : f32
    %5 = vector.broadcast %cst : f32 to vector<2x1x1x256xf32>
    %6 = arith.cmpf ogt, %4, %5 : vector<2x1x1x256xf32>
    %7 = arith.subf %3, %4 : vector<2x1x1x256xf32>
    %cst_8 = arith.constant 0.000000e+00 : f32
    %8 = vector.broadcast %cst_8 : f32 to vector<2x1x1x256xf32>
    %9 = arith.select %6, %7, %8 : vector<2x1x1x256xi1>, vector<2x1x1x256xf32>
    %c0_9 = arith.constant 0 : index
    %c0_10 = arith.constant 0 : index
    %10 = vector.load %arg5[%c0_9, %c0_10] : memref<1x256xf32, #tpu.memory_space<vmem>>, vector<1x256xf32>
    %11 = arith.mulf %9, %9 : vector<2x1x1x256xf32>
    %cst_11 = arith.constant dense<0.000000e+00> : vector<256xf32>
    %12 = vector.multi_reduction <add>, %11, %cst_11 [0, 1, 2] : vector<2x1x1x256xf32> to vector<256xf32>
    %13 = vector.shape_cast %12 : vector<256xf32> to vector<1x256xf32>
    %14 = arith.addf %10, %13 : vector<1x256xf32>
    %c0_12 = arith.constant 0 : index
    %c0_13 = arith.constant 0 : index
    %15 = vector.load %arg5[%c0_12, %c0_13] : memref<1x256xf32, #tpu.memory_space<vmem>>, vector<1x256xf32>
    tpu.vector_store %arg5[%c0_12, %c0_13], %14 {strides = array<i32>} : memref<1x256xf32, #tpu.memory_space<vmem>>, vector<1x256xf32>,
    %c0_i32_14 = arith.constant 0 : i32
    %16 = arith.cmpi eq, %arg1, %c0_i32_14 : i32
    %17 = arith.extui %16 : i1 to i32
    %c0_i32_15 = arith.constant 0 : i32
    %18 = arith.cmpi ne, %17, %c0_i32_15 : i32
    scf.if %18 {
      %c0_16 = arith.constant 0 : index
      %c0_17 = arith.constant 0 : index
      %19 = vector.load %arg5[%c0_16, %c0_17] : memref<1x256xf32, #tpu.memory_space<vmem>>, vector<1x256xf32>
      %20 = vector.shape_cast %19 : vector<1x256xf32> to vector<1x1x256xf32>
      %cst_18 = arith.constant dense<0.000000e+00> : vector<1xf32>
      %21 = vector.multi_reduction <add>, %20, %cst_18 [1, 2] : vector<1x1x256xf32> to vector<1xf32>
      %22 = vector.shape_cast %21 : vector<1xf32> to vector<1x1x1xf32>
      %23 = vector.extract %22[0, 0, 0] : f32 from vector<1x1x1xf32>
      %24 = vector.broadcast %23 : f32 to vector<1x1x128xf32>
      %c0_19 = arith.constant 0 : index
      %c0_20 = arith.constant 0 : index
      %c0_21 = arith.constant 0 : index
      %25 = vector.load %arg4[%c0_19, %c0_20, %c0_21] : memref<1x1x128xf32, #tpu.memory_space<vmem>>, vector<1x1x128xf32>
      tpu.vector_store %arg4[%c0_19, %c0_20, %c0_21], %24 {strides = array<i32>} : memref<1x1x128xf32, #tpu.memory_space<vmem>>, vector<1x1x128xf32>,
    } else {
    }
    return
  }
  func.func @transform_0(%arg0: i32, %arg1: i32) -> (i32, i32, i32, i32) {
    %c0_i32 = arith.constant 0 : i32
    %c0_i32_0 = arith.constant 0 : i32
    %c0_i32_1 = arith.constant 0 : i32
    return %c0_i32, %arg0, %arg1, %c0_i32_0 : i32, i32, i32, i32
  }
  func.func @transform_1(%arg0: i32, %arg1: i32) -> (i32, i32, i32, i32) {
    %c0_i32 = arith.constant 0 : i32
    %c0_i32_0 = arith.constant 0 : i32
    %c0_i32_1 = arith.constant 0 : i32
    return %c0_i32, %arg0, %arg1, %c0_i32_0 : i32, i32, i32, i32
  }
  func.func @transform_2(%arg0: i32, %arg1: i32) -> (i32, i32, i32) {
    %c0_i32 = arith.constant 0 : i32
    %c0_i32_0 = arith.constant 0 : i32
    %c0_i32_1 = arith.constant 0 : i32
    return %arg0, %c0_i32, %c0_i32_0 : i32, i32, i32
  }
}

</mosaic_0001>

<bundles_post_ra>
// kernel: tpu_custom_call.1
= control target key start
LH: loop header
LB: loop body
LE: loop exit
PB: predicated region body
PF: predicated region fallthrough
CT: control target
= control target key end

     0   :  { %s830_s0 = inlined_call_operand.hbm [shape: f32[2,8,1,256], index: 0, kind: input, shape index: {}]   ;;  %s831_s1 = inlined_call_operand.hbm [shape: f32[2,8,1,256], index: 1, kind: input, shape index: {}]   ;;  %s832_s2 = inlined_call_operand.hbm [shape: f32[8,1,128], index: 2, kind: output, shape index: {}]  }
   0x1   :  { %833 = sst [smem:[#allocation12_spill]] %s830_s0 }
   0x2   :  { %7 = vsyncpa [#allocation4], 0 }
   0x3   :  { %9 = vsyncpa [#allocation4 + $0x1], 0 }
   0x4   :  { %10 = vsyncpa [#allocation7], 0 }
   0x5   :  { %12 = vsyncpa [#allocation7 + $0x1], 0 }
   0x6   :  { %13 = vsyncpa [#allocation5], 0 }
   0x7   :  { %15 = vsyncpa [#allocation5 + $0x1], 0  ;;  %s675_s9 = smov 0   ;;  %s677_s10 = smov 0  }
   0x8   :  { %s679_s11 = smov 0   ;;  %s681_s12 = smov 0  }
   0x9   :  { %s683_s13 = smov 0   ;;  %s685_s14 = smov 0  }
   0xa LB: > { %s422_s15 = sadd.s32 4294967295, %s654_s14   ;;  %s423_s16 = sadd.s32 4294967294, %s654_s14   ;;  %s654_s14 = sphi %s685_s14, %s21_s14   ;;  %s650_s13 = sphi %s683_s13, %s846_s13   ;;  %s646_s12 = sphi %s681_s12, %s845_s12   ;;  %s642_s11 = sphi %s679_s11, %s844_s11   ;;  %s638_s10 = sphi %s677_s10, %s843_s10   ;;  %s634_s9 = sphi %s675_s9, %s842_s9  }
   0xb   : > { %s33_s17 = sadd.s32 1, %s650_s13  ;;  %s42_s18 = sadd.s32 1, %s642_s11 }
   0xc   : > { %p35_p0 = scmp.ge.s32.totalorder %s33_s17, 8  ;;  %p49_p1 = scmp.ne.s32.totalorder %s642_s11, %s638_s10 }
   0xd   : > { %p50_p2 = scmp.eq.s32.totalorder %s654_s14, 0  ;;  %p55_p3 = scmp.ne.s32.totalorder %s638_s10, %s634_s9 }
   0xe   : > { %s848_s17 = smov (%p35_p0, %s33_s17), 0  ;;  %p56_p5 = scmp.eq.s32.totalorder %s422_s15, 0 }
   0xf   : > { %p716_p4 = por %p50_p2, %p49_p1  ;;  %s37_s20 = ssub.s32 %s650_s13, %s848_s17 }
  0x10   : > { %p107_p6 = scmp.eq.s32.totalorder %s422_s15, 7  ;;  %p40_p7 = scmp.eq.s32.totalorder %s37_s20, 0 }
  0x11   : > { %p722_p8 = por %p56_p5, %p55_p3  ;;  %p113_p10 = scmp.eq.s32.totalorder %s423_s16, 7 }
  0x12   : > { %p726_p9 = por %p107_p6, %p49_p1  ;;  %p454_p12 = scmp.lt.s32.totalorder %s654_s14, 8 }
  0x13   : > { %s731_s23 = scalar_select %p40_p7, %s642_s11, %s42_s18  }
  0x14   : > { %p733_p11 = por %p113_p10, %p55_p3  ;;  %s739_s25 = sand.u32 1, %s642_s11  }
  0x15   : > { %s426_s26 = sshll.u32 %s739_s25, 2  ;;  %s427_s27 = sshll.u32 %s650_s13, 1 }
  0x16   : > { %s838_s0 = sld [smem:[#allocation12_spill]]  ;;  %s137_s3 = scalar_lea.vmem [#allocation3], %s426_s26 }
  0x17   : > { %s146_s4 = sshll.u32 %s137_s3, 4  ;;  %p748_p13 = pnand %p454_p12, %p716_p4  ;;  %s147_s4 = int_to_ptr.vmem [resolvable:$true] %s146_s4 }
  0x18   : > { %s134_s7 = scalar_lea.sflag [#allocation4], %s739_s25  ;;  %s656_s8 = smov 256  }
  0x19   : > { %s657_s15 = smov 32   ;;  %s658_s16 = smov 2  }
  0x1a   : > { %p430_p0 = scmp.ge.s32.totalorder %s654_s14, 1  ;;  %p177_p1 = scmp.lt.s32.totalorder %s654_s14, 9 }
  0x1b   : > { %s166_s19 = scalar_lea.hbm %s831_s1, %s427_s27  ;;  %s160_s29 = scalar_lea.vmem [#allocation6], %s426_s26 }
  0x1c   : > { %s143_s30 = scalar_lea.hbm %s838_s0, %s427_s27  ;;  %p178_p2 = pnand %p430_p0, %p177_p1 }
  0x1d   : > { %s144_s5 = sshll.u32 %s143_s30, 4  ;;  %s167_s28 = sshll.u32 %s166_s19, 4  ;;  %s145_s5 = int_to_ptr.hbm [resolvable:$true] %s144_s5  ;;  %s168_s28 = int_to_ptr.hbm [resolvable:$true] %s167_s28 }
  0x1e   : > { %446 = dma.hbm_to_vmem [thread:$0]  (!%p748_p13), %s145_s5, 64, %s147_s4, %s134_s7, %s656_s8, %s657_s15, %s658_s16  }
  0x1f   : > { %s169_s30 = sshll.u32 %s160_s29, 4  ;;  %s157_s3 = scalar_lea.sflag [#allocation7], %s739_s25  ;;  %s170_s30 = int_to_ptr.vmem [resolvable:$true] %s169_s30 }
  0x20   : > { %449 = dma.hbm_to_vmem [thread:$0]  (!%p748_p13), %s168_s28, 64, %s170_s30, %s157_s3, %s656_s8, %s657_s15, %s658_s16  }
  0x21   : > { %181 = sbr.rel (%p178_p2) target bundleno = 266 (0x10a), region = 28  ;;  %s764_s0 = sand.u32 (!%p178_p2), 1, %s638_s10  }
  0x22   : > { %s431_s4 = sshll.u32 (!%p178_p2), %s764_s0, 2  ;;  %s184_s5 = scalar_lea.sflag (!%p178_p2), [#allocation4], %s764_s0 }
  0x23   : > { %s187_s7 = scalar_lea.vmem (!%p178_p2), [#allocation3], %s431_s4 }
  0x26   : > { %621 = dma.done.wait (%p722_p8), %s184_s5, 64  }
  0x27   : > { %623 = vsyncadd (%p722_p8), %s184_s5, 4294967232  ;;  %s194_s25 = scalar_lea.sflag [#allocation7], %s764_s0  ;;  %s197_s26 = scalar_lea.vmem [#allocation6], %s431_s4 }
  0x28   : > { %625 = dma.done.wait (%p722_p8), %s194_s25, 64  }
  0x29   : > { %627 = vsyncadd (%p722_p8), %s194_s25, 4294967232  ;;  %v227_v0 = vlaneseq  ;;  %v659_v2 = vmov 0.0   ;;  %v232_v3 = vld [vmem:[%s187_s7] sm:$0x3]  ;;  %v233_v4 = vld [vmem:[%s187_s7 + $0x2] sm:$0x3]  ;;  %s317_s6 = scalar_lea.hbm %s832_s2, %s646_s12 }
  0x2a   : > { %v234_v5 = vld [vmem:[%s197_s26] sm:$0x3]  ;;  %v235_v6 = vld [vmem:[%s197_s26 + $0x2] sm:$0x3]  ;;  %vm255_vm3 = vcmask 1040384   ;;  %s222_s8 = scalar_lea.vmem [#allocation8], %s764_s0 }
  0x2b   : > { %vm777_vm0 = vcmp.lt.s32.totalorder %v227_v0, 256  ;;  %vm236_vm1 = vcmp.gt.f32.partialorder %v234_v5, -1.0  ;;  %v238_v7 = vsub.f32 %v232_v3, %v234_v5  ;;  %vm237_vm2 = vcmp.gt.f32.partialorder %v235_v6, -1.0  ;;  %s319_s15 = sshll.u32 %s222_s8, 4  ;;  %s321_s16 = sshll.u32 %s317_s6, 4  ;;  %s320_s15 = int_to_ptr.vmem [resolvable:$true] %s319_s15  ;;  %s322_s16 = int_to_ptr.hbm [resolvable:$true] %s321_s16 }
  0x2c   : > { %231 = vst.msk [vmem:[#allocation2] sm:$0x3] %vm777_vm0, %v659_v2  ;;  %v239_v8 = vsub.f32 %v233_v4, %v235_v6  ;;  %s309_s20 = scalar_lea.sflag [#allocation5], %s764_s0  ;;  %s582_s19 = sshra.s32 %s322_s16, 4  ;;  %s583_s19 = int_to_ptr.hbm [resolvable:$true] %s582_s19 }
  0x2d   : > { %v240_v9 = vsel %vm236_vm1, %v238_v7, 0.0  ;;  %s584_s28 = scalar_lea.hbm %s583_s19, 1  ;;  %s588_s12 = scalar_lea.hbm %s832_s2, 8 }
  0x2e   : > { %v241_v10 = vsel %vm237_vm2, %v239_v8, 0.0  ;;  %v243_v11 = vmul.f32 %v240_v9, %v240_v9  ;;  %p585_p3 = scmp.ne.s32.totalorder %s583_s19, %s584_s28  ;;  %p589_p6 = scmp.lt.s32.totalorder %s583_s19, %s832_s2 }
  0x2f   : > { %v244_v12 = vmul.f32 %v241_v10, %v241_v10  ;;  %p590_p7 = scmp.lt.s32.totalorder %s588_s12, %s584_s28 }
  0x30   : > { %v247_v13 = vperm.slane %v243_v11, 0  ;;  %v248_v14 = vperm.slane %v243_v11, 1  ;;  %p586_p4 = pnand %p585_p3, %p726_p9 }
  0x31   : > { %v249_v15 = vperm.slane %v244_v12, 0  ;;  %v250_v16 = vperm.slane %v244_v12, 1  ;;  %p591_p8 = por %p590_p7, %p589_p6 }
  0x32   : > { %v256_v17 = vsel %vm255_vm3, %v247_v13, 0.0  ;;  %v265_v18 = vsel %vm255_vm3, %v248_v14, 0.0  ;;  %p587_p5 = pneg %p586_p4 }
  0x33   : > { %v257_v19 = vsel %vm255_vm3, %v249_v15, 0.0  ;;  %v266_v20 = vsel %vm255_vm3, %v250_v16, 0.0  ;;  %v242_v35 = vld [vmem:[#allocation2] sm:$0x3] }
  0x34   : > { %v258_v21 = vadd.f32 %v257_v19, %v256_v17  ;;  %v267_v22 = vadd.f32 %v266_v20, %v265_v18  ;;  %p592_p10 = pnand %p591_p8, %p587_p5 }
  0x36   : > { %v259_v23 = vrot.slane %v258_v21, 4  ;;  %v268_v24 = vrot.slane %v267_v22, 4 }
  0x38   : > { %v260_v25 = vadd.f32 %v259_v23, %v258_v21  ;;  %v269_v26 = vadd.f32 %v268_v24, %v267_v22 }
  0x3a   : > { %v261_v27 = vrot.slane %v260_v25, 2  ;;  %v270_v28 = vrot.slane %v269_v26, 2 }
  0x3c   : > { %v262_v29 = vadd.f32 %v261_v27, %v260_v25  ;;  %v271_v30 = vadd.f32 %v270_v28, %v269_v26 }
  0x3e   : > { %v263_v31 = vrot.slane %v262_v29, 1  ;;  %v272_v32 = vrot.slane %v271_v30, 1 }
  0x40   : > { %v264_v33 = vadd.f32 %v263_v31, %v262_v29  ;;  %v273_v34 = vadd.f32 %v272_v32, %v271_v30 }
  0x42   : > { %v276_v36 = vrot.slane %v273_v34, 7 }
  0x44   : > { %v277_v37 = vsel %vm255_vm3, %v264_v33, %v276_v36 }
  0x45   : > { %v279_v38 = vadd.f32 %v277_v37, %v242_v35 }
  0x47   : > { %284 = vst.msk [vmem:[#allocation2] sm:$0x3] %vm777_vm0, %v279_v38 }
  0x4e   : > { %v288_v39 = vld [vmem:[#allocation2] sm:$0x3] }
  0x4f   : > { %v290_v40 = vperm.slane %v288_v39, 0  ;;  %v291_v41 = vperm.slane %v288_v39, 1 }
  0x51   : > { %v294_v42 = vsel %vm255_vm3, %v290_v40, 0.0  ;;  %v295_v43 = vsel %vm255_vm3, %v291_v41, 0.0 }
  0x52   : > { %v296_v44 = vadd.f32 %v295_v43, %v294_v42 }
  0x54   : > { %297 = vadd.xlane.f32.xlu0 %v296_v44 }
  0xc7   : > { %v298_v45 = vpop.xlane.xlu0 %297 }
  0xc8   : > { %v299_v46 = vrot.slane %v298_v45, 4 }
  0xca   : > { %v300_v47 = vadd.f32 %v299_v46, %v298_v45 }
  0xcc   : > { %v301_v48 = vrot.slane %v300_v47, 2 }
  0xce   : > { %v302_v49 = vadd.f32 %v301_v48, %v300_v47 }
  0xd0   : > { %v303_v50 = vrot.slane %v302_v49, 1 }
  0xd2   : > { %v304_v51 = vadd.f32 %v303_v50, %v302_v49 }
  0xd4   : > { %435 = vpush %v304_v51 }
 0x105   : > { %s436_s18 = spop %435 }
 0x106   : > { %v306_v52 = vstv %s436_s18 }
 0x107   : > { %307 = vst [vmem:[%s222_s8] sm:$0x1] %v306_v52 }
 0x108   : > { %595 = shalt.err (!%p592_p10)
}
 0x109   : > { %441 = dma.vmem_to_hbm [thread:$0]  (%p726_p9), %s320_s15, 16, %s322_s16, %s309_s20  }
 0x10a PF: > { %p455_p12 = scmp.ge.s32.totalorder %s654_s14, 2  ;;  %s333_s0 = sand.u32 1, %s634_s9  }
 0x10b   : > { %s334_s5 = scalar_lea.sflag [#allocation5], %s333_s0 }
 0x10c   : > { %p451_p13 = pnand %p455_p12, %p733_p11 }
 0x10e   : > { %p452_p0 = pneg %p451_p13 }
 0x110   : > { %629 = dma.done.wait (%p452_p0), %s334_s5, 16  }
 0x111   : > { %631 = vsyncadd (%p452_p0), %s334_s5, 4294967280  ;;  %s21_s14 = sadd.s32 1, %s654_s14   ;;  %s842_s9 = smov %s638_s10 }
 0x112   : > { %p18_p1 = scmp.ge.s32.totalorder %s21_s14, 10   ;;  %s843_s10 = smov %s642_s11 }
 0x113   : > { %s844_s11 = smov %s731_s23  ;;  %s845_s12 = smov %s650_s13 }
 0x114   : > { %s846_s13 = smov %s848_s17  ;;  %20 = sbr.rel (!%p18_p1) target bundleno = 10 (0xa), region = 94 }
 0x119   :  { %339 = vsyncpa [#allocation4], 1 }
 0x11a   :  { %341 = vsyncpa [#allocation4 + $0x1], 1 }
 0x11b   :  { %342 = vsyncpa [#allocation7], 1 }
 0x11c   :  { %344 = vsyncpa [#allocation7 + $0x1], 1 }
 0x11d   :  { %345 = vsyncpa [#allocation5], 1 }
 0x11e   :  { %347 = vsyncpa [#allocation5 + $0x1], 1 }

</bundles_post_ra>
